<compile_context>
chip_gen: v7x
topology: tpu7x:2x2x1
jax: 0.10.0
libtpu: 0.0.40
codegen_flags: <defaults>
</compile_context>

<pallas_src>
import functools

import jax
import jax.numpy as jnp
from jax import lax
from jax.experimental import pallas as pl
from jax.experimental.pallas import tpu as pltpu


def _round_up(x, m):
    return (x + m - 1) // m * m


# --------------------------------------------------------------------------
# Kernel: one (batch, row-tile) step.
# --------------------------------------------------------------------------
def _sad_kernel(xp_ref, xm_ref, xn_ref, mlast_ref, mfirst_ref,
                w3_ref, b3_ref, w1_ref, b1_ref, out_ref, *, num_cls):
    cf3 = w3_ref.shape[1]            # 3 * Cf_p  (fused hidden channels)
    lanes = xm_ref.shape[2]          # tile_rows * W (lane-dense spatial axis)

    m_last = mlast_ref[...]          # (1, lanes) f32, 0.0 at col W-1 (dx=0 taps)
    m_first = mfirst_ref[...]        # (1, lanes) f32, 0.0 at col 0   (dx=2 taps)

    srcs = (xp_ref, xm_ref, xn_ref)  # dy = 0 / 1 / 2 row-shifted views of x

    # 3x3 convs of all three heads: 9-step accumulation chain, no im2col.
    h = jnp.zeros((cf3, lanes), jnp.float32)
    for dy in range(3):
        src = srcs[dy][0]                            # (Cin_p, lanes) f32
        for dx in range(3):
            tap = src
            if dx == 0:                              # reads col c-1: kill col -1 wrap
                tap = tap * m_last
            elif dx == 2:                            # reads col c+1: kill col W wrap
                tap = tap * m_first
            shift = (1 - dx) % lanes                 # tap[i] = src[i + dx - 1]
            if shift:
                tap = pltpu.roll(tap, shift=shift, axis=1)   # XLU lane rotate
            h = h + jnp.dot(w3_ref[dy * 3 + dx], tap.astype(jnp.bfloat16),
                            preferred_element_type=jnp.float32)
    h = jnp.maximum(h + b3_ref[...], 0.0)            # fused ReLU, f32

    # Fused block-diagonal 1x1 convs + ReLU.
    o = jnp.dot(w1_ref[...], h.astype(jnp.bfloat16),
                preferred_element_type=jnp.float32) + b1_ref[...]
    o = jnp.maximum(o, 0.0)                          # (ctot_p, lanes) f32

    # Sigmoid only on the heatmap rows; one lane-dense store.
    row = lax.broadcasted_iota(jnp.int32, o.shape, 0)
    out_ref[0] = jnp.where(row < num_cls, jax.nn.sigmoid(o), o)


# --------------------------------------------------------------------------
# Tiling helpers.
# --------------------------------------------------------------------------
def _vmem_estimate(cin_p, cf3, ctot_p, lanes):
    # inputs (x3, double-buffered) + tap/premask temporaries + accumulators +
    # output (double-buffered) + masks + weights.
    return (4 * lanes * (3 * 2 * cin_p + 6 * cin_p + 2 * cf3 + 3 * ctot_p + 2)
            + 2 * (9 * cf3 * cin_p + ctot_p * cf3) + 4 * (cf3 + ctot_p))


def _pick_tile_rows(H, W, cin_p, cf3, ctot_p, budget=28 << 20):
    # tile_rows must divide H; tile_rows*W must be a multiple of 128 unless the
    # tile covers the full image.
    # TODO(synk): if H has no suitable divisor for a huge image, pad H in the
    # wrapper so a lane-aligned row tile always exists.
    cands = [tr for tr in range(1, H + 1)
             if H % tr == 0 and ((tr * W) % 128 == 0 or tr == H)]
    fitting = [tr for tr in cands
               if _vmem_estimate(cin_p, cf3, ctot_p, tr * W) <= budget]
    return max(fitting) if fitting else min(cands)


# --------------------------------------------------------------------------
# Wrapper.
# --------------------------------------------------------------------------
@functools.partial(jax.jit, static_argnames=("tile_rows",))
def saliency_area_detection(x_nchw, params, tile_rows=None):
    """x_nchw: (B, Cin, H, W) f32 -> (center_heatmap_pred, wh_pred, offset_pred) NCHW."""
    B, Cin, H, W = x_nchw.shape
    HW = H * W
    Cf = params["w1_heat"].shape[0]
    num_cls = params["w1_heat"].shape[1]
    ctot = num_cls + 4
    names = ("heat", "wh", "off")

    cin_p = _round_up(Cin, 8)
    cf_p = _round_up(Cf, 8)
    cf3 = 3 * cf_p
    ctot_p = _round_up(ctot, 8)

    if tile_rows is None:
        tile_rows = _pick_tile_rows(H, W, cin_p, cf3, ctot_p)
    if H % tile_rows != 0 or ((tile_rows * W) % 128 != 0 and tile_rows != H):
        raise ValueError(f"bad tile_rows={tile_rows} for H={H}, W={W}")
    lanes = tile_rows * W
    n_tiles = H // tile_rows

    # ---- weight packing (tiny; folded into the jit) ------------------------
    def pack_w3(w):                                   # (3, 3, Cin, Cf) "HWIO"
        w = jnp.pad(w, ((0, 0), (0, 0), (0, cin_p - Cin), (0, cf_p - Cf)))
        return jnp.transpose(w, (0, 1, 3, 2)).reshape(9, cf_p, cin_p)

    w3 = jnp.concatenate([pack_w3(params[f"w3_{n}"]) for n in names],
                         axis=1).astype(jnp.bfloat16)           # (9, 3Cf_p, Cin_p)

    b3 = jnp.zeros((cf3, 1), jnp.float32)
    for i, n in enumerate(names):
        b3 = b3.at[i * cf_p:i * cf_p + Cf, 0].set(params[f"b3_{n}"][0])

    outs = (num_cls, 2, 2)
    offs = (0, num_cls, num_cls + 2)
    w1_bd = jnp.zeros((cf3, ctot_p), jnp.float32)                # block-diagonal 1x1
    b1 = jnp.zeros((ctot_p, 1), jnp.float32)
    for i, n in enumerate(names):
        w1_bd = w1_bd.at[i * cf_p:i * cf_p + Cf,
                         offs[i]:offs[i] + outs[i]].set(params[f"w1_{n}"])
        b1 = b1.at[offs[i]:offs[i] + outs[i], 0].set(params[f"b1_{n}"][0])
    w1t = w1_bd.T.astype(jnp.bfloat16)                           # (ctot_p, 3Cf_p)

    # ---- activation prep: channel pad + row-shifted halo views -------------
    x = x_nchw.astype(jnp.float32)
    if cin_p != Cin:
        x = jnp.pad(x, ((0, 0), (0, cin_p - Cin), (0, 0), (0, 0)))
    zrow = jnp.zeros((B, cin_p, 1, W), jnp.float32)
    x_prev = jnp.concatenate([zrow, x[:, :, :H - 1, :]], axis=2)  # x_prev[r] = x[r-1]
    x_next = jnp.concatenate([x[:, :, 1:, :], zrow], axis=2)      # x_next[r] = x[r+1]
    x_mid_f = x.reshape(B, cin_p, HW)
    x_prev_f = x_prev.reshape(B, cin_p, HW)
    x_next_f = x_next.reshape(B, cin_p, HW)

    col = jnp.arange(lanes, dtype=jnp.int32) % W
    m_last = (col != W - 1).astype(jnp.float32).reshape(1, lanes)   # dx=0 taps
    m_first = (col != 0).astype(jnp.float32).reshape(1, lanes)      # dx=2 taps

    # ---- pallas_call --------------------------------------------------------
    kernel = functools.partial(_sad_kernel, num_cls=num_cls)

    xspec = pl.BlockSpec((1, cin_p, lanes), lambda b, t: (b, 0, t))
    mspec = pl.BlockSpec((1, lanes), lambda b, t: (0, 0))

    def full(shape):
        return pl.BlockSpec(shape, lambda b, t: (0,) * len(shape))

    vmem_limit = int(min(max(2 * _vmem_estimate(cin_p, cf3, ctot_p, lanes),
                             16 * 1024 * 1024), 64 * 1024 * 1024))

    out = pl.pallas_call(
        kernel,
        out_shape=jax.ShapeDtypeStruct((B, ctot_p, HW), jnp.float32),
        grid_spec=pltpu.PrefetchScalarGridSpec(
            num_scalar_prefetch=0,
            grid=(B, n_tiles),
            # TODO(synk): for deployments with tiny H*W and large B, also block
            # the batch axis to amortize the ~0.35us per-grid-step overhead.
            in_specs=[
                xspec, xspec, xspec,       # x_prev / x / x_next row-tiles
                mspec, mspec,              # horizontal boundary premasks
                full((9, cf3, cin_p)),     # per-tap 3x3 weights (bf16)
                full((cf3, 1)),            # 3x3 bias (f32)
                full((ctot_p, cf3)),       # block-diag 1x1 weights (bf16)
                full((ctot_p, 1)),         # 1x1 bias (f32)
            ],
            out_specs=pl.BlockSpec((1, ctot_p, lanes), lambda b, t: (b, 0, t)),
        ),
        compiler_params=pltpu.CompilerParams(
            dimension_semantics=("parallel", "parallel"),
            vmem_limit_bytes=vmem_limit),
    )(x_prev_f, x_mid_f, x_next_f, m_last, m_first, w3, b3, w1t, b1)

    # (B, ctot_p, H*W) -> three NCHW outputs: pure slices + reshapes.
    hm = out[:, :num_cls].reshape(B, num_cls, H, W)
    wh = out[:, num_cls:num_cls + 2].reshape(B, 2, H, W)
    off = out[:, num_cls + 2:num_cls + 4].reshape(B, 2, H, W)
    return hm, wh, off


# --------------------------------------------------------------------------
# Parameter init + plain-JAX reference for the self-test.
# --------------------------------------------------------------------------
def init_params(key, in_channels, feat_channels, num_cls):
    ks = jax.random.split(key, 12)

    def w(k, shape, scale=0.1):
        return scale * jax.random.normal(k, shape, dtype=jnp.float32)

    params = {}
    outs = {"heat": num_cls, "wh": 2, "off": 2}
    i = 0
    for name, cout in outs.items():
        params[f"w3_{name}"] = w(ks[i], (3, 3, in_channels, feat_channels)); i += 1
        params[f"b3_{name}"] = w(ks[i], (1, feat_channels)); i += 1
        params[f"w1_{name}"] = w(ks[i], (feat_channels, cout)); i += 1
        params[f"b1_{name}"] = w(ks[i], (1, cout)); i += 1
    return params


def _reference(x_nchw, params):
    """Plain-JAX reference (NCHW convs) matching the PyTorch module."""
    def head(x, w3, b3, w1, b1):
        w3_oihw = jnp.transpose(w3, (3, 2, 0, 1))            # HWIO -> OIHW
        y = lax.conv_general_dilated(x, w3_oihw, (1, 1), ((1, 1), (1, 1)),
                                     dimension_numbers=("NCHW", "OIHW", "NCHW"))
        y = jnp.maximum(y + b3.reshape(1, -1, 1, 1), 0.0)
        w1_oihw = jnp.transpose(w1, (1, 0)).reshape(w1.shape[1], w1.shape[0], 1, 1)
        z = lax.conv_general_dilated(y, w1_oihw, (1, 1), ((0, 0), (0, 0)),
                                     dimension_numbers=("NCHW", "OIHW", "NCHW"))
        return jnp.maximum(z + b1.reshape(1, -1, 1, 1), 0.0)

    hm = head(x_nchw, params["w3_heat"], params["b3_heat"],
              params["w1_heat"], params["b1_heat"])
    wh = head(x_nchw, params["w3_wh"], params["b3_wh"],
              params["w1_wh"], params["b1_wh"])
    off = head(x_nchw, params["w3_off"], params["b3_off"],
               params["w1_off"], params["b1_off"])
    return jax.nn.sigmoid(hm), wh, off


if __name__ == "__main__":
    B, Cin, H, W = 2, 4, 16, 16
    Cf, num_cls = 8, 2

    key = jax.random.PRNGKey(0)
    kx, kp = jax.random.split(key)
    x = jax.random.normal(kx, (B, Cin, H, W), dtype=jnp.float32)
    params = init_params(kp, Cin, Cf, num_cls)

    ref_c, ref_w, ref_o = _reference(x, params)

    # Multi-tile spatial grid (exercises the halo path) and auto-tiled default.
    for tr in (8, None):
        center, wh, off = saliency_area_detection(x, params, tile_rows=tr)
        jax.block_until_ready((center, wh, off))
        assert center.shape == (B, num_cls, H, W)
        assert wh.shape == (B, 2, H, W)
        assert off.shape == (B, 2, H, W)
        assert jnp.allclose(center, ref_c, atol=1e-2, rtol=1e-2)
        assert jnp.allclose(wh, ref_w, atol=1e-2, rtol=1e-2)
        assert jnp.allclose(off, ref_o, atol=1e-2, rtol=1e-2)

    print("KERNEL_OK")
</pallas_src>

<mosaic_0001>
module attributes {stable_mosaic.version = 11 : i64} {
  func.func @_sad_kernel(%arg0: i32, %arg1: i32, %arg2: memref<1x8x128xf32, #tpu.memory_space<vmem>>, %arg3: memref<1x8x128xf32, #tpu.memory_space<vmem>>, %arg4: memref<1x8x128xf32, #tpu.memory_space<vmem>>, %arg5: memref<1x128xf32, #tpu.memory_space<vmem>>, %arg6: memref<1x128xf32, #tpu.memory_space<vmem>>, %arg7: memref<9x24x8xbf16, #tpu.memory_space<vmem>>, %arg8: memref<24x1xf32, #tpu.memory_space<vmem>>, %arg9: memref<8x24xbf16, #tpu.memory_space<vmem>>, %arg10: memref<8x1xf32, #tpu.memory_space<vmem>>, %arg11: memref<1x8x128xf32, #tpu.memory_space<vmem>>) attributes {dimension_semantics = [#tpu.dimension_semantics<parallel>, #tpu.dimension_semantics<parallel>], iteration_bounds = array<i64: 2, 2>, scalar_prefetch = 0 : i64, scratch_operands = 0 : i64, tpu.core_type = #tpu.core_type<tc>, window_params = [{transform_indices = @transform_0, window_bounds = array<i64: 1, 8, 128>}, {transform_indices = @transform_1, window_bounds = array<i64: 1, 8, 128>}, {transform_indices = @transform_2, window_bounds = array<i64: 1, 8, 128>}, {pipeline_mode = #tpu.pipeline_mode<synchronous>, transform_indices = @transform_3, window_bounds = array<i64: 1, 128>}, {pipeline_mode = #tpu.pipeline_mode<synchronous>, transform_indices = @transform_4, window_bounds = array<i64: 1, 128>}, {pipeline_mode = #tpu.pipeline_mode<synchronous>, transform_indices = @transform_5, window_bounds = array<i64: 9, 24, 8>}, {pipeline_mode = #tpu.pipeline_mode<synchronous>, transform_indices = @transform_6, window_bounds = array<i64: 24, 1>}, {pipeline_mode = #tpu.pipeline_mode<synchronous>, transform_indices = @transform_7, window_bounds = array<i64: 8, 24>}, {pipeline_mode = #tpu.pipeline_mode<synchronous>, transform_indices = @transform_8, window_bounds = array<i64: 8, 1>}, {transform_indices = @transform_9, window_bounds = array<i64: 1, 8, 128>}]} {
    %c0 = arith.constant 0 : index
    %c0_0 = arith.constant 0 : index
    %0 = vector.load %arg5[%c0, %c0_0] : memref<1x128xf32, #tpu.memory_space<vmem>>, vector<1x128xf32>
    %c0_1 = arith.constant 0 : index
    %c0_2 = arith.constant 0 : index
    %1 = vector.load %arg6[%c0_1, %c0_2] : memref<1x128xf32, #tpu.memory_space<vmem>>, vector<1x128xf32>
    %cst = arith.constant 0.000000e+00 : f32
    %2 = vector.broadcast %cst : f32 to vector<24x128xf32>
    %c0_3 = arith.constant 0 : index
    %c0_4 = arith.constant 0 : index
    %c0_5 = arith.constant 0 : index
    %3 = vector.load %arg2[%c0_3, %c0_4, %c0_5] : memref<1x8x128xf32, #tpu.memory_space<vmem>>, vector<1x8x128xf32>
    %4 = vector.shape_cast %3 : vector<1x8x128xf32> to vector<8x128xf32>
    %5 = vector.broadcast %0 : vector<1x128xf32> to vector<8x128xf32>
    %6 = arith.mulf %4, %5 : vector<8x128xf32>
    %c1_i32 = arith.constant 1 : i32
    %7 = tpu.dynamic_rotate %6 by %c1_i32 dim 1 : vector<8x128xf32>, i32 -> vector<8x128xf32>
    %c0_6 = arith.constant 0 : index
    %c0_7 = arith.constant 0 : index
    %c0_8 = arith.constant 0 : index
    %8 = vector.load %arg7[%c0_6, %c0_7, %c0_8] : memref<9x24x8xbf16, #tpu.memory_space<vmem>>, vector<1x24x8xbf16>
    %9 = vector.shape_cast %8 : vector<1x24x8xbf16> to vector<24x8xbf16>
    %10 = arith.truncf %7 : vector<8x128xf32> to vector<8x128xbf16>
    %cst_9 = arith.constant dense<0.000000e+00> : vector<24x128xf32>
    %11 = tpu.matmul %9, %10, %cst_9 {dimension_numbers = #tpu.dot_dimension_numbers<[1], [0], [0], [1], [0, 0, 1, 1], [], []>} : vector<24x8xbf16>, vector<8x128xbf16>, vector<24x128xf32> -> vector<24x128xf32>
    %12 = arith.addf %2, %11 : vector<24x128xf32>
    %c1 = arith.constant 1 : index
    %c0_10 = arith.constant 0 : index
    %c0_11 = arith.constant 0 : index
    %13 = vector.load %arg7[%c1, %c0_10, %c0_11] : memref<9x24x8xbf16, #tpu.memory_space<vmem>>, vector<1x24x8xbf16>
    %14 = vector.shape_cast %13 : vector<1x24x8xbf16> to vector<24x8xbf16>
    %15 = arith.truncf %4 : vector<8x128xf32> to vector<8x128xbf16>
    %cst_12 = arith.constant dense<0.000000e+00> : vector<24x128xf32>
    %16 = tpu.matmul %14, %15, %cst_12 {dimension_numbers = #tpu.dot_dimension_numbers<[1], [0], [0], [1], [0, 0, 1, 1], [], []>} : vector<24x8xbf16>, vector<8x128xbf16>, vector<24x128xf32> -> vector<24x128xf32>
    %17 = arith.addf %12, %16 : vector<24x128xf32>
    %18 = vector.broadcast %1 : vector<1x128xf32> to vector<8x128xf32>
    %19 = arith.mulf %4, %18 : vector<8x128xf32>
    %c127_i32 = arith.constant 127 : i32
    %20 = tpu.dynamic_rotate %19 by %c127_i32 dim 1 : vector<8x128xf32>, i32 -> vector<8x128xf32>
    %c2 = arith.constant 2 : index
    %c0_13 = arith.constant 0 : index
    %c0_14 = arith.constant 0 : index
    %21 = vector.load %arg7[%c2, %c0_13, %c0_14] : memref<9x24x8xbf16, #tpu.memory_space<vmem>>, vector<1x24x8xbf16>
    %22 = vector.shape_cast %21 : vector<1x24x8xbf16> to vector<24x8xbf16>
    %23 = arith.truncf %20 : vector<8x128xf32> to vector<8x128xbf16>
    %cst_15 = arith.constant dense<0.000000e+00> : vector<24x128xf32>
    %24 = tpu.matmul %22, %23, %cst_15 {dimension_numbers = #tpu.dot_dimension_numbers<[1], [0], [0], [1], [0, 0, 1, 1], [], []>} : vector<24x8xbf16>, vector<8x128xbf16>, vector<24x128xf32> -> vector<24x128xf32>
    %25 = arith.addf %17, %24 : vector<24x128xf32>
    %c0_16 = arith.constant 0 : index
    %c0_17 = arith.constant 0 : index
    %c0_18 = arith.constant 0 : index
    %26 = vector.load %arg3[%c0_16, %c0_17, %c0_18] : memref<1x8x128xf32, #tpu.memory_space<vmem>>, vector<1x8x128xf32>
    %27 = vector.shape_cast %26 : vector<1x8x128xf32> to vector<8x128xf32>
    %28 = vector.broadcast %0 : vector<1x128xf32> to vector<8x128xf32>
    %29 = arith.mulf %27, %28 : vector<8x128xf32>
    %c1_i32_19 = arith.constant 1 : i32
    %30 = tpu.dynamic_rotate %29 by %c1_i32_19 dim 1 : vector<8x128xf32>, i32 -> vector<8x128xf32>
    %c3 = arith.constant 3 : index
    %c0_20 = arith.constant 0 : index
    %c0_21 = arith.constant 0 : index
    %31 = vector.load %arg7[%c3, %c0_20, %c0_21] : memref<9x24x8xbf16, #tpu.memory_space<vmem>>, vector<1x24x8xbf16>
    %32 = vector.shape_cast %31 : vector<1x24x8xbf16> to vector<24x8xbf16>
    %33 = arith.truncf %30 : vector<8x128xf32> to vector<8x128xbf16>
    %cst_22 = arith.constant dense<0.000000e+00> : vector<24x128xf32>
    %34 = tpu.matmul %32, %33, %cst_22 {dimension_numbers = #tpu.dot_dimension_numbers<[1], [0], [0], [1], [0, 0, 1, 1], [], []>} : vector<24x8xbf16>, vector<8x128xbf16>, vector<24x128xf32> -> vector<24x128xf32>
    %35 = arith.addf %25, %34 : vector<24x128xf32>
    %c4 = arith.constant 4 : index
    %c0_23 = arith.constant 0 : index
    %c0_24 = arith.constant 0 : index
    %36 = vector.load %arg7[%c4, %c0_23, %c0_24] : memref<9x24x8xbf16, #tpu.memory_space<vmem>>, vector<1x24x8xbf16>
    %37 = vector.shape_cast %36 : vector<1x24x8xbf16> to vector<24x8xbf16>
    %38 = arith.truncf %27 : vector<8x128xf32> to vector<8x128xbf16>
    %cst_25 = arith.constant dense<0.000000e+00> : vector<24x128xf32>
    %39 = tpu.matmul %37, %38, %cst_25 {dimension_numbers = #tpu.dot_dimension_numbers<[1], [0], [0], [1], [0, 0, 1, 1], [], []>} : vector<24x8xbf16>, vector<8x128xbf16>, vector<24x128xf32> -> vector<24x128xf32>
    %40 = arith.addf %35, %39 : vector<24x128xf32>
    %41 = vector.broadcast %1 : vector<1x128xf32> to vector<8x128xf32>
    %42 = arith.mulf %27, %41 : vector<8x128xf32>
    %c127_i32_26 = arith.constant 127 : i32
    %43 = tpu.dynamic_rotate %42 by %c127_i32_26 dim 1 : vector<8x128xf32>, i32 -> vector<8x128xf32>
    %c5 = arith.constant 5 : index
    %c0_27 = arith.constant 0 : index
    %c0_28 = arith.constant 0 : index
    %44 = vector.load %arg7[%c5, %c0_27, %c0_28] : memref<9x24x8xbf16, #tpu.memory_space<vmem>>, vector<1x24x8xbf16>
    %45 = vector.shape_cast %44 : vector<1x24x8xbf16> to vector<24x8xbf16>
    %46 = arith.truncf %43 : vector<8x128xf32> to vector<8x128xbf16>
    %cst_29 = arith.constant dense<0.000000e+00> : vector<24x128xf32>
    %47 = tpu.matmul %45, %46, %cst_29 {dimension_numbers = #tpu.dot_dimension_numbers<[1], [0], [0], [1], [0, 0, 1, 1], [], []>} : vector<24x8xbf16>, vector<8x128xbf16>, vector<24x128xf32> -> vector<24x128xf32>
    %48 = arith.addf %40, %47 : vector<24x128xf32>
    %c0_30 = arith.constant 0 : index
    %c0_31 = arith.constant 0 : index
    %c0_32 = arith.constant 0 : index
    %49 = vector.load %arg4[%c0_30, %c0_31, %c0_32] : memref<1x8x128xf32, #tpu.memory_space<vmem>>, vector<1x8x128xf32>
    %50 = vector.shape_cast %49 : vector<1x8x128xf32> to vector<8x128xf32>
    %51 = vector.broadcast %0 : vector<1x128xf32> to vector<8x128xf32>
    %52 = arith.mulf %50, %51 : vector<8x128xf32>
    %c1_i32_33 = arith.constant 1 : i32
    %53 = tpu.dynamic_rotate %52 by %c1_i32_33 dim 1 : vector<8x128xf32>, i32 -> vector<8x128xf32>
    %c6 = arith.constant 6 : index
    %c0_34 = arith.constant 0 : index
    %c0_35 = arith.constant 0 : index
    %54 = vector.load %arg7[%c6, %c0_34, %c0_35] : memref<9x24x8xbf16, #tpu.memory_space<vmem>>, vector<1x24x8xbf16>
    %55 = vector.shape_cast %54 : vector<1x24x8xbf16> to vector<24x8xbf16>
    %56 = arith.truncf %53 : vector<8x128xf32> to vector<8x128xbf16>
    %cst_36 = arith.constant dense<0.000000e+00> : vector<24x128xf32>
    %57 = tpu.matmul %55, %56, %cst_36 {dimension_numbers = #tpu.dot_dimension_numbers<[1], [0], [0], [1], [0, 0, 1, 1], [], []>} : vector<24x8xbf16>, vector<8x128xbf16>, vector<24x128xf32> -> vector<24x128xf32>
    %58 = arith.addf %48, %57 : vector<24x128xf32>
    %c7 = arith.constant 7 : index
    %c0_37 = arith.constant 0 : index
    %c0_38 = arith.constant 0 : index
    %59 = vector.load %arg7[%c7, %c0_37, %c0_38] : memref<9x24x8xbf16, #tpu.memory_space<vmem>>, vector<1x24x8xbf16>
    %60 = vector.shape_cast %59 : vector<1x24x8xbf16> to vector<24x8xbf16>
    %61 = arith.truncf %50 : vector<8x128xf32> to vector<8x128xbf16>
    %cst_39 = arith.constant dense<0.000000e+00> : vector<24x128xf32>
    %62 = tpu.matmul %60, %61, %cst_39 {dimension_numbers = #tpu.dot_dimension_numbers<[1], [0], [0], [1], [0, 0, 1, 1], [], []>} : vector<24x8xbf16>, vector<8x128xbf16>, vector<24x128xf32> -> vector<24x128xf32>
    %63 = arith.addf %58, %62 : vector<24x128xf32>
    %64 = vector.broadcast %1 : vector<1x128xf32> to vector<8x128xf32>
    %65 = arith.mulf %50, %64 : vector<8x128xf32>
    %c127_i32_40 = arith.constant 127 : i32
    %66 = tpu.dynamic_rotate %65 by %c127_i32_40 dim 1 : vector<8x128xf32>, i32 -> vector<8x128xf32>
    %c8 = arith.constant 8 : index
    %c0_41 = arith.constant 0 : index
    %c0_42 = arith.constant 0 : index
    %67 = vector.load %arg7[%c8, %c0_41, %c0_42] : memref<9x24x8xbf16, #tpu.memory_space<vmem>>, vector<1x24x8xbf16>
    %68 = vector.shape_cast %67 : vector<1x24x8xbf16> to vector<24x8xbf16>
    %69 = arith.truncf %66 : vector<8x128xf32> to vector<8x128xbf16>
    %cst_43 = arith.constant dense<0.000000e+00> : vector<24x128xf32>
    %70 = tpu.matmul %68, %69, %cst_43 {dimension_numbers = #tpu.dot_dimension_numbers<[1], [0], [0], [1], [0, 0, 1, 1], [], []>} : vector<24x8xbf16>, vector<8x128xbf16>, vector<24x128xf32> -> vector<24x128xf32>
    %71 = arith.addf %63, %70 : vector<24x128xf32>
    %c0_44 = arith.constant 0 : index
    %c0_45 = arith.constant 0 : index
    %72 = vector.load %arg8[%c0_44, %c0_45] : memref<24x1xf32, #tpu.memory_space<vmem>>, vector<24x1xf32>
    %73 = vector.broadcast %72 : vector<24x1xf32> to vector<24x128xf32>
    %74 = arith.addf %71, %73 : vector<24x128xf32>
    %cst_46 = arith.constant 0.000000e+00 : f32
    %75 = vector.broadcast %cst_46 : f32 to vector<24x128xf32>
    %76 = arith.maximumf %74, %75 : vector<24x128xf32>
    %c0_47 = arith.constant 0 : index
    %c0_48 = arith.constant 0 : index
    %77 = vector.load %arg9[%c0_47, %c0_48] : memref<8x24xbf16, #tpu.memory_space<vmem>>, vector<8x24xbf16>
    %78 = arith.truncf %76 : vector<24x128xf32> to vector<24x128xbf16>
    %cst_49 = arith.constant dense<0.000000e+00> : vector<8x128xf32>
    %79 = tpu.matmul %77, %78, %cst_49 {dimension_numbers = #tpu.dot_dimension_numbers<[1], [0], [0], [1], [0, 0, 1, 1], [], []>} : vector<8x24xbf16>, vector<24x128xbf16>, vector<8x128xf32> -> vector<8x128xf32>
    %c0_50 = arith.constant 0 : index
    %c0_51 = arith.constant 0 : index
    %80 = vector.load %arg10[%c0_50, %c0_51] : memref<8x1xf32, #tpu.memory_space<vmem>>, vector<8x1xf32>
    %81 = vector.broadcast %80 : vector<8x1xf32> to vector<8x128xf32>
    %82 = arith.addf %79, %81 : vector<8x128xf32>
    %cst_52 = arith.constant 0.000000e+00 : f32
    %83 = vector.broadcast %cst_52 : f32 to vector<8x128xf32>
    %84 = arith.maximumf %82, %83 : vector<8x128xf32>
    %85 = tpu.iota {dimensions = array<i32: 0>} : vector<8x128xi32>
    %c2_i32 = arith.constant 2 : i32
    %86 = vector.broadcast %c2_i32 : i32 to vector<8x128xi32>
    %87 = arith.cmpi slt, %85, %86 : vector<8x128xi32>
    %88 = arith.negf %84 : vector<8x128xf32>
    %89 = math.exp %88 : vector<8x128xf32>
    %cst_53 = arith.constant 1.000000e+00 : f32
    %90 = vector.broadcast %cst_53 : f32 to vector<8x128xf32>
    %91 = arith.addf %90, %89 : vector<8x128xf32>
    %92 = arith.divf %90, %91 : vector<8x128xf32>
    %93 = arith.select %87, %92, %84 : vector<8x128xi1>, vector<8x128xf32>
    %c0_54 = arith.constant 0 : index
    %c0_55 = arith.constant 0 : index
    %c0_56 = arith.constant 0 : index
    %94 = vector.load %arg11[%c0_54, %c0_55, %c0_56] : memref<1x8x128xf32, #tpu.memory_space<vmem>>, vector<1x8x128xf32>
    %95 = vector.shape_cast %94 : vector<1x8x128xf32> to vector<8x128xf32>
    %96 = vector.shape_cast %93 : vector<8x128xf32> to vector<1x8x128xf32>
    tpu.vector_store %arg11[%c0_54, %c0_55, %c0_56], %96 {strides = array<i32>} : memref<1x8x128xf32, #tpu.memory_space<vmem>>, vector<1x8x128xf32>,
    return
  }
  func.func @transform_0(%arg0: i32, %arg1: i32) -> (i32, i32, i32) {
    %c0_i32 = arith.constant 0 : i32
    %c0_i32_0 = arith.constant 0 : i32
    return %arg0, %c0_i32, %arg1 : i32, i32, i32
  }
  func.func @transform_1(%arg0: i32, %arg1: i32) -> (i32, i32, i32) {
    %c0_i32 = arith.constant 0 : i32
    %c0_i32_0 = arith.constant 0 : i32
    return %arg0, %c0_i32, %arg1 : i32, i32, i32
  }
  func.func @transform_2(%arg0: i32, %arg1: i32) -> (i32, i32, i32) {
    %c0_i32 = arith.constant 0 : i32
    %c0_i32_0 = arith.constant 0 : i32
    return %arg0, %c0_i32, %arg1 : i32, i32, i32
  }
  func.func @transform_3(%arg0: i32, %arg1: i32) -> (i32, i32) {
    %c0_i32 = arith.constant 0 : i32
    %c0_i32_0 = arith.constant 0 : i32
    %c0_i32_1 = arith.constant 0 : i32
    return %c0_i32, %c0_i32_0 : i32, i32
  }
  func.func @transform_4(%arg0: i32, %arg1: i32) -> (i32, i32) {
    %c0_i32 = arith.constant 0 : i32
    %c0_i32_0 = arith.constant 0 : i32
    %c0_i32_1 = arith.constant 0 : i32
    return %c0_i32, %c0_i32_0 : i32, i32
  }
  func.func @transform_5(%arg0: i32, %arg1: i32) -> (i32, i32, i32) {
    %c0_i32 = arith.constant 0 : i32
    %c0_i32_0 = arith.constant 0 : i32
    %c0_i32_1 = arith.constant 0 : i32
    %c0_i32_2 = arith.constant 0 : i32
    return %c0_i32, %c0_i32_0, %c0_i32_1 : i32, i32, i32
  }
  func.func @transform_6(%arg0: i32, %arg1: i32) -> (i32, i32) {
    %c0_i32 = arith.constant 0 : i32
    %c0_i32_0 = arith.constant 0 : i32
    %c0_i32_1 = arith.constant 0 : i32
    return %c0_i32, %c0_i32_0 : i32, i32
  }
  func.func @transform_7(%arg0: i32, %arg1: i32) -> (i32, i32) {
    %c0_i32 = arith.constant 0 : i32
    %c0_i32_0 = arith.constant 0 : i32
    %c0_i32_1 = arith.constant 0 : i32
    return %c0_i32, %c0_i32_0 : i32, i32
  }
  func.func @transform_8(%arg0: i32, %arg1: i32) -> (i32, i32) {
    %c0_i32 = arith.constant 0 : i32
    %c0_i32_0 = arith.constant 0 : i32
    %c0_i32_1 = arith.constant 0 : i32
    return %c0_i32, %c0_i32_0 : i32, i32
  }
  func.func @transform_9(%arg0: i32, %arg1: i32) -> (i32, i32, i32) {
    %c0_i32 = arith.constant 0 : i32
    %c0_i32_0 = arith.constant 0 : i32
    return %arg0, %c0_i32, %arg1 : i32, i32, i32
  }
}

</mosaic_0001>

<bundles_post_ra>
// kernel: saliency_area_detection.1
= control target key start
LH: loop header
LB: loop body
LE: loop exit
PB: predicated region body
PF: predicated region fallthrough
CT: control target
= control target key end

     0   :  { %s1672_s30 = smov 0   ;;  %s1674_s10 = smov 0   ;;  %s1850_s0 = inlined_call_operand.vmem [shape: f32[2,8,256], index: 0, kind: input, shape index: {}]   ;;  %s1851_s1 = inlined_call_operand.vmem [shape: f32[2,8,256], index: 1, kind: input, shape index: {}]   ;;  %s1852_s2 = inlined_call_operand.vmem [shape: f32[2,8,256], index: 2, kind: input, shape index: {}]   ;;  %s1853_s3 = inlined_call_operand.vmem [shape: f32[1,128], index: 3, kind: input, shape index: {}]   ;;  %s1854_s4 = inlined_call_operand.vmem [shape: f32[1,128], index: 4, kind: input, shape index: {}]   ;;  %s1855_s5 = inlined_call_operand.vmem [shape: bf16[9,24,8], index: 5, kind: input, shape index: {}]   ;;  %s1856_s6 = inlined_call_operand.vmem [shape: f32[24,1], index: 6, kind: input, shape index: {}]   ;;  %s1857_s7 = inlined_call_operand.vmem [shape: bf16[8,24], index: 7, kind: input, shape index: {}]   ;;  %s1858_s8 = inlined_call_operand.vmem [shape: f32[8,1], index: 8, kind: input, shape index: {}]   ;;  %s1859_s9 = inlined_call_operand.vmem [shape: f32[2,8,256], index: 9, kind: output, shape index: {}]  }
   0x1   :  { %s1676_s11 = smov 0   ;;  %s1678_s12 = smov 0  }
   0x2   :  { %s1680_s13 = smov 0  }
   0x3 LB: > { %s28_s14 = sadd.s32 1, %s1607_s11  ;;  %s31_s15 = sadd.s32 1, %s1611_s12  ;;  %s1615_s13 = sphi %s1680_s13, %s19_s13   ;;  %s1611_s12 = sphi %s1678_s12, %s1863_s12   ;;  %s1607_s11 = sphi %s1676_s11, %s1862_s11   ;;  %s1603_s10 = sphi %s1674_s10, %s1861_s10   ;;  %s1599_s30 = sphi %s1672_s30, %s1860_s30  }
   0x4   : > { %p29_p0 = scmp.ge.s32.totalorder %s28_s14, 2  ;;  %p1332_p1 = scmp.ge.s32.totalorder %s1615_s13, 1 }
   0x5   : > { %p336_p2 = scmp.lt.s32.totalorder %s1615_s13, 5 }
   0x6   : > { %s1865_s14 = smov (%p29_p0, %s28_s14), 0  ;;  %s1867_s15 = smov (!%p29_p0, %s31_s15), %s1611_s12 }
   0x7   : > { %p337_p3 = pnand %p1332_p1, %p336_p2  ;;  %p33_p4 = scmp.ge.s32.totalorder %s1867_s15, 2 }
   0x8   : > { %p394_p5 = scmp.lt.s32.totalorder (!%p337_p3), %s1603_s10, 1  ;;  %p396_p6 = scmp.lt.s32.totalorder (!%p337_p3), %s1599_s30, 1  ;;  %v1555_v0 = vld [vmem:[%s1855_s5 + $0xc] sm:$0xff] (!%p337_p3)   ;;  %vm456_vm0 = vcmask (!%p337_p3), 64512   ;;  %v1557_v1 = vld [vmem:[%s1855_s5] sm:$0xff] (!%p337_p3)   ;;  %vm463_vm1 = vcmask (!%p337_p3), 1043456  }
   0x9   : > { %s1869_s15 = smov (%p33_p4, %s1867_s15), 0  ;;  %340 = sbr.rel (%p337_p3) target bundleno = 647 (0x287), region = 56 }
   0xa   : > { %1439 = vmatprep.mubr.msk.bf16.mxu0 (!%p337_p3), %vm456_vm0, %v1555_v0  ;;  %1445 = vmatprep.mubr.msk.bf16.mxu1 (!%p337_p3), %vm456_vm0, %v1557_v1  ;;  %v1341_v2 = vld [vmem:[%s1853_s3] ss:$0 sm:$0xff] (!%p337_p3)  ;;  %v1556_v13 = vld [vmem:[%s1855_s5 + $0x14] ss:$0 sps:$4 sm:$0xff] (!%p337_p3)   ;;  %v1559_v14 = vld [vmem:[%s1855_s5 + $0x18] sm:$0xff] (!%p337_p3)   ;;  %s1618_s26 = smov (!%p337_p3), 127  }
   0xb   : > { %v1353_v4 = vld [vmem:[%s1854_s4] ss:$0 sm:$0xff] (!%p337_p3)  ;;  %v1115_v17 = vld [vmem:[%s1856_s6 + $0x8] sm:$0xff] (!%p337_p3)  ;;  %v1619_v19 = vmov (!%p337_p3), 0   ;;  %v1116_v20 = vld [vmem:[%s1856_s6 + $0x10] sm:$0xff] (!%p337_p3)  ;;  %v1620_v62 = vmov (!%p337_p3), 0.0  }
   0xc   : > { %v1114_v18 = vld [vmem:[%s1856_s6] sm:$0xff] (!%p337_p3)  ;;  %1554 = vset.pattern.permute.xlu1 (!%p337_p3), %v1619_v19  ;;  %1553 = vset.pattern.permute.xlu0 (!%p337_p3), %v1619_v19  ;;  %v1558_v27 = vld [vmem:[%s1855_s5 + $0x8] ss:$0 sps:$4 sm:$0xff] (!%p337_p3)   ;;  %v1563_v37 = vld [vmem:[%s1855_s5 + $0x30] sm:$0xff] (!%p337_p3)   ;;  %vm1621_vm2 = vmmov (!%p337_p3), 0   ;;  %vm1147_vm3 = vcmask (!%p337_p3), 195584  }
   0xd   : > { %v1141_v21 = vld [vmem:[%s1858_s8] sm:$0xff] (!%p337_p3)  ;;  %v1562_v41 = vld [vmem:[%s1855_s5 + $0x2c] ss:$0 sps:$4 sm:$0xff] (!%p337_p3)   ;;  %v1564_v46 = vld [vmem:[%s1855_s5 + $0x38] ss:$0 sps:$4 sm:$0xff] (!%p337_p3)  }
   0xe   : > { %v1561_v33 = vld [vmem:[%s1855_s5 + $0x24] sm:$0xff] (!%p337_p3)   ;;  %v1560_v36 = vld [vmem:[%s1855_s5 + $0x20] ss:$0 sps:$4 sm:$0xff] (!%p337_p3)   ;;  %v1569_v51 = vld [vmem:[%s1855_s5 + $0x54] sm:$0xff] (!%p337_p3)  }
   0xf   : > { %v1565_v42 = vld [vmem:[%s1855_s5 + $0x3c] sm:$0xff] (!%p337_p3)   ;;  %v1567_v47 = vld [vmem:[%s1855_s5 + $0x48] sm:$0xff] (!%p337_p3)   ;;  %v1566_v50 = vld [vmem:[%s1855_s5 + $0x44] ss:$0 sps:$4 sm:$0xff] (!%p337_p3)  }
  0x10   : > { %s1871_s10 = smov (!%p394_p5, %s1603_s10), 1  ;;  %s1873_s30 = smov (!%p396_p6, %s1599_s30), 1  ;;  %v1568_v53 = vld [vmem:[%s1855_s5 + $0x50] ss:$0 sps:$4 sm:$0xff]   ;;  %v1571_v54 = vld [vmem:[%s1855_s5 + $0x60] sm:$0xff]  }
  0x11   : > { %s1333_s20 = sshll.u32 %s1871_s10, 1  ;;  %v1570_v56 = vld [vmem:[%s1855_s5 + $0x5c] ss:$0 sps:$4 sm:$0xff]   ;;  %v1572_v57 = vld [vmem:[%s1855_s5 + $0x68] ss:$0 sps:$4 sm:$0xff]  }
  0x12   : > { %s399_s21 = sadd.s32 %s1333_s20, %s1873_s30  ;;  %s1617_s20 = smov 1  }
  0x13   : > { %s1710_s22 = sshll.u32 %s399_s21, 3 }
  0x14   : > { %s401_s27 = scalar_lea.vmem %s1850_s0, %s1710_s22  ;;  %s409_s10 = scalar_lea.vmem %s1851_s1, %s1710_s22 }
  0x15   : > { %v429_v3 = vld [vmem:[%s401_s27] sm:$0xff]  ;;  %s417_s19 = scalar_lea.vmem %s1852_s2, %s1710_s22  ;;  %s425_s21 = scalar_lea.vmem %s1859_s9, %s1710_s22 }
  0x16   : > { %v662_v5 = vld [vmem:[%s409_s10] sm:$0xff]  ;;  %v436_v6 = vmul.f32 %v1341_v2, %v429_v3  ;;  %v447_v8 = vpack.c.bf16 %v429_v3, %v429_v3  ;;  %v586_v9 = vmul.f32 %v1353_v4, %v429_v3 }
  0x17   : > { %v663_v7 = vmul.f32 %v1341_v2, %v662_v5  ;;  %v812_v10 = vmul.f32 %v1353_v4, %v662_v5  ;;  %v888_v11 = vld [vmem:[%s417_s19] sm:$0xff]  ;;  %v743_v30 = vpack.c.bf16 %v662_v5, %v662_v5 }
  0x18   : > { %437 = vrot.lane.b32.xlu0 %v436_v6, %s1617_s20  ;;  %1499 = vmatprep.subr.msk.bf16.mxu0 %vm463_vm1, %v447_v8  ;;  %v465_v12 = vsel %vm463_vm1, %v447_v8, 0  ;;  %v889_v15 = vmul.f32 %v1341_v2, %v888_v11  ;;  %v1038_v16 = vmul.f32 %v1353_v4, %v888_v11  ;;  %v969_v44 = vpack.c.bf16 %v888_v11, %v888_v11 }
  0x19   : > { %664 = vrot.lane.b32.xlu1 %v663_v7, %s1617_s20  ;;  %1438 = vmatpush3.bf16.msra.mxu0 %v465_v12  ;;  %v759_v39 = vsel %vm463_vm1, %v743_v30, 0 }
  0x1a   : > { %v985_v52 = vsel %vm463_vm1, %v969_v44, 0 }
  0x1c   : > { %587 = vrot.lane.b32.xlu0 %v586_v9, %s1618_s26  ;;  %1440 = vmatmul.mubr.msk.bf16.vlgmr.msra.gmra.mrb[0].mxu0 %vm456_vm0, %v1556_v13 }
  0x1d   : > { %813 = vrot.lane.b32.xlu1 %v812_v10, %s1618_s26  ;;  %1451 = vmatprep.mubr.msk.bf16.mxu0 %vm456_vm0, %v1559_v14 }
  0x20   : > { %890 = vrot.lane.b32.xlu0 %v889_v15, %s1617_s20 }
  0x21   : > { %1039 = vrot.lane.b32.xlu1 %v1038_v16, %s1618_s26 }
  0x24   : > { %1119 = vperm.xlu0 %1553, %v1114_v18  }
  0x25   : > { %1124 = vperm.xlu1 %1554, %v1115_v17  }
  0x28   : > { %1144 = vperm.xlu0 %1553, %v1141_v21  }
  0x29   : > { %1129 = vperm.xlu1 %1554, %v1116_v20  }
  0x8a   : > { %v438_v22 = vpop.permute.xlu0 %437 }
  0x8b   : > { %v665_v23 = vpop.permute.xlu1 %664  ;;  %v442_v24 = vpack.c.bf16 %v438_v22, %v438_v22 }
  0x8c   : > { %v670_v25 = vpack.c.bf16 %v665_v23, %v665_v23 }
  0x8d   : > { %1500 = vmatprep.subr.msk.bf16.mxu1 %vm463_vm1, %v442_v24  ;;  %v530_v26 = vsel %vm463_vm1, %v442_v24, 0 }
  0x8e   : > { %1444 = vmatpush3.bf16.msra.mxu1 %v530_v26  ;;  %v588_v28 = vpop.permute.xlu0 %587  ;;  %v686_v32 = vsel %vm463_vm1, %v670_v25, 0 }
  0x8f   : > { %v814_v29 = vpop.permute.xlu1 %813  ;;  %v593_v31 = vpack.c.bf16 %v588_v28, %v588_v28  ;;  %1502 = vmatprep.subr.msk.bf16.mxu1 %vm463_vm1, %v670_v25 }
  0x90   : > { %v819_v34 = vpack.c.bf16 %v814_v29, %v814_v29 }
  0x91   : > { %v609_v35 = vsel %vm463_vm1, %v593_v31, 0  ;;  %1446 = vmatmul.mubr.msk.bf16.vlgmr.msra.gmra.mrb[0].mxu1 %vm456_vm0, %v1558_v27  ;;  %1501 = vmatprep.subr.msk.bf16.mxu0 %vm463_vm1, %v593_v31 }
  0x92   : > { %1450 = vmatpush3.bf16.msra.mxu0 %v609_v35  ;;  %1456 = vmatpush3.bf16.msra.mxu1 %v686_v32  ;;  %v891_v38 = vpop.permute.xlu0 %890  ;;  %v835_v43 = vsel %vm463_vm1, %v819_v34, 0 }
  0x93   : > { %1457 = vmatprep.mubr.msk.bf16.mxu1 %vm456_vm0, %v1561_v33  ;;  %1503 = vmatprep.subr.msk.bf16.mxu0 %vm463_vm1, %v743_v30  ;;  %v896_v40 = vpack.c.bf16 %v891_v38, %v891_v38  ;;  %v1040_v45 = vpop.permute.xlu1 %1039 }
  0x94   : > { %1504 = vmatprep.subr.msk.bf16.mxu1 %vm463_vm1, %v819_v34  ;;  %v1045_v49 = vpack.c.bf16 %v1040_v45, %v1040_v45 }
  0x95   : > { %1452 = vmatmul.mubr.msk.bf16.vlgmr.msra.gmra.mrb[4].mxu0 %vm456_vm0, %v1560_v36  ;;  %v912_v48 = vsel %vm463_vm1, %v896_v40, 0 }
  0x96   : > { %1462 = vmatpush3.bf16.msra.mxu0 %v759_v39  ;;  %1463 = vmatprep.mubr.msk.bf16.mxu0 %vm456_vm0, %v1563_v37  ;;  %v1061_v55 = vsel %vm463_vm1, %v1045_v49, 0 }
  0x97   : > { %1505 = vmatprep.subr.msk.bf16.mxu0 %vm463_vm1, %v896_v40 }
  0x99   : > { %1458 = vmatmul.mubr.msk.bf16.vlgmr.msra.gmra.mrb[4].mxu1 %vm456_vm0, %v1562_v41 }
  0x9a   : > { %1468 = vmatpush3.bf16.msra.mxu1 %v835_v43  ;;  %1469 = vmatprep.mubr.msk.bf16.mxu1 %vm456_vm0, %v1565_v42 }
  0x9b   : > { %1506 = vmatprep.subr.msk.bf16.mxu1 %vm463_vm1, %v969_v44 }
  0x9d   : > { %1464 = vmatmul.mubr.msk.bf16.vlgmr.msra.gmra.mrb[8].mxu0 %vm456_vm0, %v1564_v46 }
  0x9e   : > { %1474 = vmatpush3.bf16.msra.mxu0 %v912_v48  ;;  %1475 = vmatprep.mubr.msk.bf16.mxu0 %vm456_vm0, %v1567_v47 }
  0x9f   : > { %1507 = vmatprep.subr.msk.bf16.mxu0 %vm463_vm1, %v1045_v49 }
  0xa1   : > { %1470 = vmatmul.mubr.msk.bf16.vlgmr.msra.gmra.mrb[8].mxu1 %vm456_vm0, %v1566_v50 }
  0xa2   : > { %1480 = vmatpush3.bf16.msra.mxu1 %v985_v52  ;;  %1481 = vmatprep.mubr.msk.bf16.mxu1 %vm456_vm0, %v1569_v51 }
  0xa3   : > { %1491 = vmatprep.subr.bf16.mxu1 %v1620_v62 }
  0xa4   : > { %v1125_v39 = vpop.permute.xlu1 %1124 }
  0xa5   : > { %1476 = vmatmul.mubr.msk.bf16.vlgmr.msra.gmra.mrb[12].mxu0 %vm456_vm0, %v1568_v53 }
  0xa6   : > { %1486 = vmatpush3.bf16.msra.mxu0 %v1061_v55  ;;  %1487 = vmatprep.mubr.msk.bf16.mxu0 %vm456_vm0, %v1571_v54 }
  0xa8   : > { %v1130_v50 = vpop.permute.xlu1 %1129 }
  0xa9   : > { %1482 = vmatmul.mubr.msk.bf16.vlgmr.msra.gmra.mrb[12].mxu1 %vm456_vm0, %v1570_v56 }
  0xaa   : > { %1495 = vmatprep.mubr.msk.bf16.mxu1 %vm1621_vm2, %v1620_v62 }
  0xad   : > { %1488 = vmatmul.mubr.msk.bf16.vlgmr.msra.gmra.mrb[16].mxu0 %vm456_vm0, %v1572_v57  ;;  %v1120_v57 = vpop.permute.xlu0 %1119 }
  0xef   : > { %v1441_v58 = vpop.f32.mrb[0].mxu0 }
  0xf0   : > { %v501_v59 = vpop.f32.mrb[1].mxu0 }
  0xf1   : > { %v1442_v60 = vpop.f32.mrb[2].mxu0 }
  0xf2   : > { %v504_v61 = vpop.f32.mrb[3].mxu0 }
 0x164   : > { %v1447_v63 = vpop.f32.mrb[0].mxu1 }
 0x165   : > { %v575_v0 = vadd.f32 %v1447_v63, %v1441_v58  ;;  %v566_v1 = vpop.f32.mrb[1].mxu1 }
 0x166   : > { %v567_v2 = vadd.f32 %v566_v1, %v501_v59  ;;  %v1448_v3 = vpop.f32.mrb[2].mxu1 }
 0x167   : > { %v569_v4 = vpop.f32.mrb[3].mxu1 }
 0x168   : > { %v570_v5 = vadd.f32 %v569_v4, %v504_v61  ;;  %v1453_v6 = vpop.f32.mrb[4].mxu0  ;;  %v1138_v4 = vld [vmem:[%s1857_s7] sm:$0xf] }
 0x169   : > { %v661_v7 = vadd.f32 %v1453_v6, %v575_v0  ;;  %v645_v8 = vpop.f32.mrb[5].mxu0 }
 0x16a   : > { %v659_v9 = vadd.f32 %v645_v8, %v567_v2  ;;  %v1454_v10 = vpop.f32.mrb[6].mxu0 }
 0x16b   : > { %v648_v11 = vpop.f32.mrb[7].mxu0 }
 0x16c   : > { %v660_v12 = vadd.f32 %v648_v11, %v570_v5  ;;  %v1459_v13 = vpop.f32.mrb[4].mxu1  ;;  %v1145_v5 = vpop.permute.xlu0 %1144 }
 0x16d   : > { %v738_v14 = vadd.f32 %v1459_v13, %v661_v7  ;;  %v722_v15 = vpop.f32.mrb[5].mxu1 }
 0x16e   : > { %v736_v16 = vadd.f32 %v722_v15, %v659_v9  ;;  %v1460_v17 = vpop.f32.mrb[6].mxu1 }
 0x16f   : > { %v725_v18 = vpop.f32.mrb[7].mxu1 }
 0x170   : > { %v737_v19 = vadd.f32 %v725_v18, %v660_v12  ;;  %v1465_v20 = vpop.f32.mrb[8].mxu0 }
 0x171   : > { %v811_v21 = vadd.f32 %v1465_v20, %v738_v14  ;;  %v795_v22 = vpop.f32.mrb[9].mxu0  ;;  %v1195_v14 = vlaneseq }
 0x172   : > { %v809_v23 = vadd.f32 %v795_v22, %v736_v16  ;;  %v1466_v24 = vpop.f32.mrb[10].mxu0 }
 0x173   : > { %v798_v25 = vpop.f32.mrb[11].mxu0  ;;  %v1196_v15 = vshrl.u32 %v1195_v14, 7 }
 0x174   : > { %v810_v26 = vadd.f32 %v798_v25, %v737_v19  ;;  %v1471_v27 = vpop.f32.mrb[8].mxu1 }
 0x175   : > { %v887_v28 = vadd.f32 %v1471_v27, %v811_v21  ;;  %v871_v29 = vpop.f32.mrb[9].mxu1  ;;  %vm1197_vm4 = vcmp.lt.s32.totalorder %v1196_v15, 2 }
 0x176   : > { %v885_v30 = vadd.f32 %v871_v29, %v809_v23  ;;  %v1472_v31 = vpop.f32.mrb[10].mxu1 }
 0x177   : > { %v874_v32 = vpop.f32.mrb[11].mxu1 }
 0x178   : > { %v886_v33 = vadd.f32 %v874_v32, %v810_v26  ;;  %v1477_v34 = vpop.f32.mrb[12].mxu0 }
 0x179   : > { %v964_v35 = vadd.f32 %v1477_v34, %v887_v28  ;;  %v948_v36 = vpop.f32.mrb[13].mxu0 }
 0x17a   : > { %v962_v37 = vadd.f32 %v948_v36, %v885_v30  ;;  %v1478_v38 = vpop.f32.mrb[14].mxu0 }
 0x17b   : > { %v951_v40 = vpop.f32.mrb[15].mxu0 }
 0x17c   : > { %v963_v41 = vadd.f32 %v951_v40, %v886_v33  ;;  %v1483_v42 = vpop.f32.mrb[12].mxu1 }
 0x17d   : > { %v1037_v43 = vadd.f32 %v1483_v42, %v964_v35  ;;  %v1021_v44 = vpop.f32.mrb[13].mxu1 }
 0x17e   : > { %v1035_v45 = vadd.f32 %v1021_v44, %v962_v37  ;;  %v1484_v46 = vpop.f32.mrb[14].mxu1 }
 0x17f   : > { %v1024_v47 = vpop.f32.mrb[15].mxu1 }
 0x180   : > { %v1036_v48 = vadd.f32 %v1024_v47, %v963_v41  ;;  %v1489_v49 = vpop.f32.mrb[16].mxu0 }
 0x181   : > { %v1113_v51 = vadd.f32 %v1489_v49, %v1037_v43  ;;  %v1097_v52 = vpop.f32.mrb[17].mxu0 }
 0x182   : > { %v1111_v53 = vadd.f32 %v1097_v52, %v1035_v45  ;;  %v1490_v54 = vpop.f32.mrb[18].mxu0 }
 0x183   : > { %v1134_v55 = vadd.f32 %v1130_v50, %v1113_v51  ;;  %v1100_v56 = vpop.f32.mrb[19].mxu0 }
 0x184   : > { %v1112_v58 = vadd.f32 %v1100_v56, %v1036_v48  ;;  %v1132_v59 = vadd.f32 %v1120_v57, %v1111_v53 }
 0x185   : > { %v1137_v61 = vmax.f32 %v1134_v55, 0.0 }
 0x186   : > { %v1133_v60 = vadd.f32 %v1125_v39, %v1112_v58  ;;  %v1135_v0 = vmax.f32 %v1132_v59, 0.0 }
 0x187   : > { %v1140_v2 = vpack.c.bf16 %v1137_v61, %v1137_v61 }
 0x188   : > { %v1136_v63 = vmax.f32 %v1133_v60, 0.0 }
 0x189   : > { %v1152_v3 = vsel %vm463_vm1, %v1140_v2, 0 }
 0x18a   : > { %v1139_v1 = vpack.c.bf16 %v1136_v63, %v1135_v0 }
 0x18c   : > { %1492 = vmatpush3.bf16.msra.mxu1 %v1139_v1 }
 0x18d   : > { %1493 = vmatprep.subr.bf16.mxu1 %v1620_v62 }
 0x190   : > { %1494 = vmatpush3.bf16.msra.mxu1 %v1152_v3 }
 0x193   : > { %1496 = vmatmul.mubr.msk.bf16.vlgmr.msra.gmra.mrb[16].mxu1 %vm1147_vm3, %v1138_v4 }
 0x266   : > { %v1188_v6 = vpop.f32.mrb[16].mxu1 }
 0x267   : > { %v1189_v7 = vadd.f32 %v1188_v6, %v1145_v5  ;;  %v1497_v8 = vpop.f32.mrb[17].mxu1 }
 0x268   : > { %v1191_v9 = vpop.f32.mrb[18].mxu1 }
 0x269   : > { %v1194_v10 = vmax.f32 %v1189_v7, 0.0  ;;  %v1498_v11 = vpop.f32.mrb[19].mxu1 }
 0x26b   : > { %v1404_v12 = vmul.f32 -1.442695, %v1194_v10 }
 0x26d   : > { %1573 = vpow2.f32 %v1404_v12 }
 0x277   : > { %v1574_v62 = vpop.eup %1573 }
 0x278   : > { %v1201_v13 = vadd.f32 1.0, %v1574_v62 }
 0x27a   : > { %1575 = vrcp.f32 %v1201_v13 }
 0x284   : > { %v1576_v16 = vpop.eup %1575 }
 0x285   : > { %v1204_v17 = vsel %vm1197_vm4, %v1576_v16, %v1194_v10 }
 0x286   : > { %1205 = vst [vmem:[%s425_s21] sm:$0xff] %v1204_v17 }
 0x287 PF: > { %s19_s13 = sadd.s32 1, %s1615_s13   ;;  %s1860_s30 = smov %s1607_s11 }
 0x288   : > { %p16_p7 = scmp.ge.s32.totalorder %s19_s13, 6   ;;  %s1861_s10 = smov %s1611_s12 }
 0x289   : > { %s1862_s11 = smov %s1865_s14  ;;  %s1863_s12 = smov %s1869_s15 }
 0x28a   :  { %18 = sbr.rel (!%p16_p7) target bundleno = 3 (0x3), region = 100 }

</bundles_post_ra>
